<compile_context>
chip_gen: v7x
topology: tpu7x:2x2x1
jax: 0.10.0
libtpu: 0.0.40
codegen_flags: <defaults>
</compile_context>

<pallas_src>
import functools

import jax
import jax.numpy as jnp
from jax.experimental import pallas as pl
from jax.experimental.pallas import tpu as pltpu

TEMP = 0.05          # PromptBERT default temperature (wrapper accepts any temp)
EPS = 1e-8           # torch.nn.CosineSimilarity eps default


def _round_up(a: int, b: int) -> int:
    return (a + b - 1) // b * b


def _similarity_kernel(x_ref, yt_ref, nx_ref, ny_ref, o_ref, *, inv_temp):
    # Blocks: x (tm, H), yT (H, tn), nx (tm, 1), ny (1, tn), o (tm, tn).
    # Raw tiles straight to the MXU (native dtype, f32 accumulator).
    acc = jnp.dot(x_ref[...], yt_ref[...], preferred_element_type=jnp.float32)
    # torch.nn.CosineSimilarity: dot / max(||x|| * ||y||, eps)  -- exact clamp
    # semantics, applied as a cheap rank-1 epilogue on the f32 accumulator.
    denom = jnp.maximum(nx_ref[...] * ny_ref[...], EPS)        # (tm, tn)
    o_ref[...] = (acc * pl.reciprocal(denom, approx=False) * inv_temp
                  ).astype(o_ref.dtype)


def similarity(x, y, temp=TEMP):
    """Pallas equivalent of Similarity(temp)(x, y) for the PromptBERT usage.

    Accepts:
      x: (M, 1, H) or (M, H)
      y: (1, N, H) or (N, H)
    Returns (M, N) float32: cosine similarity along the last dim, / temp.
    """
    if x.ndim == 3:
        x = x.reshape(-1, x.shape[-1])
    if y.ndim == 3:
        y = y.reshape(-1, y.shape[-1])
    M, H = x.shape
    N, H2 = y.shape
    assert H == H2, f"feature dims must match, got {H} vs {H2}"

    # Common native dtype for the matmul operands (bf16 stays bf16 on the MXU).
    dt = jnp.promote_types(x.dtype, y.dtype)
    x = x.astype(dt)
    y = y.astype(dt)
    itemsize = jnp.dtype(dt).itemsize
    sub = {4: 8, 2: 16, 1: 32}.get(itemsize, 8)   # dtype-native sublane count

    # ---- tile selection -----------------------------------------------------
    tm = min(512, _round_up(M, sub))
    np128 = _round_up(N, 128)
    # Make y fully resident (streamed from HBM once) when it is small.
    if 2 * np128 * H * itemsize <= (8 << 20):
        tn = np128
    else:
        tn = min(512, np128)

    def _raw_bytes(tm_, tn_):
        # Double-buffered VMEM footprint of all blocks.
        return (2 * tm_ * H * itemsize        # x tile
                + 2 * H * tn_ * itemsize      # yT tile
                + 2 * tm_ * tn_ * 4           # f32 output tile
                + 2 * tm_ * 128 * 4           # nx (lane-padded to 128)
                + 2 * 8 * tn_ * 4)            # ny (sublane-padded to 8)

    budget = 28 << 20                         # keep 1.5x * budget <= ~44 MiB
    while _raw_bytes(tm, tn) > budget and (tm > sub or tn > 128):
        if tn >= tm and tn > 128:
            tn = max(128, _round_up(tn // 2, 128))
        elif tm > sub:
            tm = max(sub, _round_up(tm // 2, sub))
        else:
            break

    Mp = _round_up(M, tm)
    Np = _round_up(N, tn)
    if Mp != M:
        x = jnp.pad(x, ((0, Mp - M), (0, 0)))
    if Np != N:
        y = jnp.pad(y, ((0, Np - N), (0, 0)))

    # Precompute per-row L2 norms once (f32).  Padded rows get norm 0 -> the
    # eps clamp makes their (discarded) outputs finite zeros.
    xf = x.astype(jnp.float32)
    yf = y.astype(jnp.float32)
    nx = jnp.sqrt(jnp.sum(xf * xf, axis=-1, keepdims=True))       # (Mp, 1)
    ny = jnp.sqrt(jnp.sum(yf * yf, axis=-1))[None, :]             # (1, Np)
    yT = y.T                                                      # (H, Np)

    grid = (Mp // tm, Np // tn)
    cost = pl.CostEstimate(
        flops=2 * Mp * Np * H,
        transcendentals=Mp * Np,
        bytes_accessed=(Mp * H + grid[0] * Np * H) * itemsize + Mp * Np * 4,
    )

    raw = _raw_bytes(tm, tn)
    vmem_limit = min(48 << 20, max(int(raw * 1.5) + (2 << 20), 32 << 20))

    kernel = functools.partial(_similarity_kernel, inv_temp=float(1.0 / temp))

    out = pl.pallas_call(
        kernel,
        out_shape=jax.ShapeDtypeStruct((Mp, Np), jnp.float32),
        grid_spec=pltpu.PrefetchScalarGridSpec(
            num_scalar_prefetch=0,
            grid=grid,
            in_specs=[
                pl.BlockSpec((tm, H), lambda i, j: (i, 0)),   # x
                pl.BlockSpec((H, tn), lambda i, j: (0, j)),   # yT
                pl.BlockSpec((tm, 1), lambda i, j: (i, 0)),   # row norms of x
                pl.BlockSpec((1, tn), lambda i, j: (0, j)),   # row norms of y
            ],
            out_specs=pl.BlockSpec((tm, tn), lambda i, j: (i, j)),
        ),
        compiler_params=pltpu.CompilerParams(
            dimension_semantics=("parallel", "parallel"),
            vmem_limit_bytes=vmem_limit,
        ),
        cost_estimate=cost,
    )(x, yT, nx, ny)

    if (Mp, Np) != (M, N):
        out = out[:M, :N]
    return out


def _reference(x, y, temp=TEMP):
    # Pure-JAX reference mirroring torch.nn.CosineSimilarity(dim=-1) with the
    # PromptBERT broadcast convention.
    if x.ndim == 2:
        x = x[:, None, :]
    if y.ndim == 2:
        y = y[None, :, :]
    x = x.astype(jnp.float32)
    y = y.astype(jnp.float32)
    dots = jnp.sum(x * y, axis=-1)
    nx = jnp.linalg.norm(x, axis=-1)
    ny = jnp.linalg.norm(y, axis=-1)
    return dots / jnp.maximum(nx * ny, EPS) / temp


if __name__ == "__main__":
    key = jax.random.PRNGKey(0)
    kx, ky, kx2, ky2, kx3, ky3 = jax.random.split(key, 6)

    # Test 1: PromptBERT call convention: z1.unsqueeze(1) vs z2.unsqueeze(0).
    B, H = 8, 32
    x = jax.random.normal(kx, (B, 1, H), dtype=jnp.float32)
    y = jax.random.normal(ky, (1, B, H), dtype=jnp.float32)
    out = jax.block_until_ready(similarity(x, y, temp=TEMP))
    ref = _reference(x, y, temp=TEMP)
    assert out.shape == (B, B)
    assert jnp.allclose(out, ref, atol=1e-4, rtol=1e-4), (
        f"max abs err = {jnp.max(jnp.abs(out - ref))}"
    )

    # Test 2: non-aligned M/N (exercises minimal padding + lane-dense output).
    M2, N2, H2 = 12, 40, 96
    x2 = jax.random.normal(kx2, (M2, 1, H2), dtype=jnp.float32)
    y2 = jax.random.normal(ky2, (1, N2, H2), dtype=jnp.float32)
    out2 = jax.block_until_ready(similarity(x2, y2, temp=TEMP))
    ref2 = _reference(x2, y2, temp=TEMP)
    assert out2.shape == (M2, N2)
    assert jnp.allclose(out2, ref2, atol=1e-4, rtol=1e-4), (
        f"max abs err = {jnp.max(jnp.abs(out2 - ref2))}"
    )

    # Test 3: bf16 inputs (native-dtype MXU matmul, f32 epilogue scaling).
    M3, N3, H3 = 16, 24, 64
    x3 = jax.random.normal(kx3, (M3, H3), dtype=jnp.float32).astype(jnp.bfloat16)
    y3 = jax.random.normal(ky3, (N3, H3), dtype=jnp.float32).astype(jnp.bfloat16)
    out3 = jax.block_until_ready(similarity(x3, y3, temp=TEMP))
    ref3 = _reference(x3, y3, temp=TEMP)
    assert out3.shape == (M3, N3)
    assert jnp.allclose(out3, ref3, atol=1e-3, rtol=1e-3), (
        f"max abs err = {jnp.max(jnp.abs(out3 - ref3))}"
    )

    print("KERNEL_OK")
</pallas_src>

<mosaic_0001>
module attributes {stable_mosaic.version = 11 : i64} {
  func.func @_similarity_kernel(%arg0: i32, %arg1: i32, %arg2: memref<8x32xf32, #tpu.memory_space<vmem>>, %arg3: memref<32x128xf32, #tpu.memory_space<vmem>>, %arg4: memref<8x1xf32, #tpu.memory_space<vmem>>, %arg5: memref<1x128xf32, #tpu.memory_space<vmem>>, %arg6: memref<8x128xf32, #tpu.memory_space<vmem>>) attributes {dimension_semantics = [#tpu.dimension_semantics<parallel>, #tpu.dimension_semantics<parallel>], iteration_bounds = array<i64: 1, 1>, scalar_prefetch = 0 : i64, scratch_operands = 0 : i64, tpu.core_type = #tpu.core_type<tc>, window_params = [{transform_indices = @transform_0, window_bounds = array<i64: 8, 32>}, {transform_indices = @transform_1, window_bounds = array<i64: 32, 128>}, {transform_indices = @transform_2, window_bounds = array<i64: 8, 1>}, {transform_indices = @transform_3, window_bounds = array<i64: 1, 128>}, {transform_indices = @transform_4, window_bounds = array<i64: 8, 128>}]} {
    %c0 = arith.constant 0 : index
    %c0_0 = arith.constant 0 : index
    %0 = vector.load %arg2[%c0, %c0_0] : memref<8x32xf32, #tpu.memory_space<vmem>>, vector<8x32xf32>
    %c0_1 = arith.constant 0 : index
    %c0_2 = arith.constant 0 : index
    %1 = vector.load %arg3[%c0_1, %c0_2] : memref<32x128xf32, #tpu.memory_space<vmem>>, vector<32x128xf32>
    %cst = arith.constant dense<0.000000e+00> : vector<8x128xf32>
    %2 = tpu.matmul %0, %1, %cst {dimension_numbers = #tpu.dot_dimension_numbers<[1], [0], [0], [1], [0, 0, 1, 1], [], []>} : vector<8x32xf32>, vector<32x128xf32>, vector<8x128xf32> -> vector<8x128xf32>
    %c0_3 = arith.constant 0 : index
    %c0_4 = arith.constant 0 : index
    %3 = vector.load %arg4[%c0_3, %c0_4] : memref<8x1xf32, #tpu.memory_space<vmem>>, vector<8x1xf32>
    %c0_5 = arith.constant 0 : index
    %c0_6 = arith.constant 0 : index
    %4 = vector.load %arg5[%c0_5, %c0_6] : memref<1x128xf32, #tpu.memory_space<vmem>>, vector<1x128xf32>
    %5 = vector.broadcast %3 : vector<8x1xf32> to vector<8x128xf32>
    %6 = vector.broadcast %4 : vector<1x128xf32> to vector<8x128xf32>
    %7 = arith.mulf %5, %6 : vector<8x128xf32>
    %cst_7 = arith.constant 9.99999993E-9 : f32
    %8 = vector.broadcast %cst_7 : f32 to vector<8x128xf32>
    %9 = arith.maximumf %7, %8 : vector<8x128xf32>
    %10 = tpu.reciprocal %9 : vector<8x128xf32> -> vector<8x128xf32>
    %11 = arith.mulf %2, %10 : vector<8x128xf32>
    %cst_8 = arith.constant 2.000000e+01 : f32
    %12 = vector.broadcast %cst_8 : f32 to vector<8x128xf32>
    %13 = arith.mulf %11, %12 : vector<8x128xf32>
    %c0_9 = arith.constant 0 : index
    %c0_10 = arith.constant 0 : index
    %14 = vector.load %arg6[%c0_9, %c0_10] : memref<8x128xf32, #tpu.memory_space<vmem>>, vector<8x128xf32>
    tpu.vector_store %arg6[%c0_9, %c0_10], %13 {strides = array<i32>} : memref<8x128xf32, #tpu.memory_space<vmem>>, vector<8x128xf32>,
    return
  }
  func.func @transform_0(%arg0: i32, %arg1: i32) -> (i32, i32) {
    %c0_i32 = arith.constant 0 : i32
    %c0_i32_0 = arith.constant 0 : i32
    return %arg0, %c0_i32 : i32, i32
  }
  func.func @transform_1(%arg0: i32, %arg1: i32) -> (i32, i32) {
    %c0_i32 = arith.constant 0 : i32
    %c0_i32_0 = arith.constant 0 : i32
    return %c0_i32, %arg1 : i32, i32
  }
  func.func @transform_2(%arg0: i32, %arg1: i32) -> (i32, i32) {
    %c0_i32 = arith.constant 0 : i32
    %c0_i32_0 = arith.constant 0 : i32
    return %arg0, %c0_i32 : i32, i32
  }
  func.func @transform_3(%arg0: i32, %arg1: i32) -> (i32, i32) {
    %c0_i32 = arith.constant 0 : i32
    %c0_i32_0 = arith.constant 0 : i32
    return %c0_i32, %arg1 : i32, i32
  }
  func.func @transform_4(%arg0: i32, %arg1: i32) -> (i32, i32) {
    %c0_i32 = arith.constant 0 : i32
    return %arg0, %arg1 : i32, i32
  }
}

</mosaic_0001>

<bundles_post_ra>
// kernel: tpu_custom_call.1
= control target key start
LH: loop header
LB: loop body
LE: loop exit
PB: predicated region body
PF: predicated region fallthrough
CT: control target
= control target key end

     0   :  { %9 = vsyncpa [#allocation3], 0  ;;  %s294_s0 = inlined_call_operand.vmem [shape: f32[8,32], index: 0, kind: input, shape index: {}]   ;;  %s295_s1 = inlined_call_operand.hbm [shape: f32[32,128], index: 1, kind: input, shape index: {}]   ;;  %s296_s2 = inlined_call_operand.vmem [shape: f32[8,1], index: 2, kind: input, shape index: {}]   ;;  %s297_s3 = inlined_call_operand.vmem [shape: f32[1,128], index: 3, kind: input, shape index: {}]   ;;  %s298_s4 = inlined_call_operand.hbm [shape: f32[8,128], index: 4, kind: output, shape index: {}]  }
   0x1   :  { %10 = vsyncpa [#allocation4], 0  ;;  %s228_s15 = smov [#allocation2]   ;;  %s180_s19 = scalar_lea.hbm %s295_s1, 512 }
   0x2   :  { %s18_s16 = sshll.u32 %s228_s15, 4  ;;  %p181_p0 = scmp.ne.s32.totalorder %s295_s1, %s180_s19  ;;  %s19_s16 = int_to_ptr.vmem [resolvable:$true] %s18_s16 }
   0x3   :  { %p184_p1 = scmp.lt.u32.totalorder %s180_s19, %s295_s1 }
   0x5   :  { %p186_p2 = pnand %p184_p1, %p181_p0 }
   0x7   :  { %189 = shalt.err (!%p186_p2)
}
   0x8   :  { %s190_s24 = scalar_lea.vmem %s19_s16, 512  ;;  %p195_p4 = scmp.lt.s32.totalorder %s19_s16, %s19_s16 }
   0x9   :  { %p191_p3 = scmp.ne.s32.totalorder %s19_s16, %s190_s24  ;;  %p196_p5 = scmp.lt.s32.totalorder %s190_s24, %s190_s24 }
   0xb   :  { %p197_p6 = por %p196_p5, %p195_p4 }
   0xd   :  { %p198_p7 = pnand %p197_p6, %p191_p3 }
   0xf   :  { %201 = shalt.err (!%p198_p7)
}
  0x10   :  { %s229_s25 = smov 128   ;;  %s230_s26 = smov 8  }
  0x11   :  { %24 = dma.hbm_to_vmem [thread:$0]  %s295_s1, 512, %s19_s16, [#allocation3], %s229_s25, %s229_s25, %s230_s26  }
  0x12   :  { %224 = dma.done.wait [#allocation3], 512  }
  0x13   :  { %225 = vsyncadd [#allocation3], 4294966784  ;;  %v231_v0 = vmov 0.0|0.0   ;;  %vm232_vm0 = vmmov 0   ;;  %v233_v1 = vmov 0.0   ;;  %v234_v2 = vmov 0  }
  0x14   :  { %163 = vmatprep.subr.bf16.mxu0 %v231_v0  ;;  %160 = vmatprep.mubr.msk.f32.mxu0 %vm232_vm0, %v233_v1  ;;  %v33_v3 = vld [vmem:[#allocation2] sm:$0xff]  ;;  %v34_v4 = vld [vmem:[#allocation2 + $0x8] sm:$0xff]  ;;  %v35_v5 = vld [vmem:[#allocation2 + $0x10] sm:$0xff]  ;;  %vm37_vm1 = vcmask 261120  }
  0x15   :  { %177 = vset.pattern.permute.xlu0 %v234_v2  ;;  %v164_v6 = vpack.c.bf16 %v34_v4, %v33_v3  ;;  %v36_v7 = vld [vmem:[#allocation2 + $0x18] sm:$0xff]  ;;  %v111_v8 = vld [vmem:[%s296_s2] sm:$0xff]  ;;  %s235_s2 = smov [#allocation5]  }
  0x16   :  { %115 = vperm.xlu0 %177, %v111_v8   ;;  %v167_v9 = vpack.c.bf16 %v36_v7, %v35_v5  ;;  %v32_v10 = vld [vmem:[%s294_s0] sm:$0xff]  ;;  %s136_s8 = sshll.u32 %s235_s2, 4  ;;  %s137_s8 = int_to_ptr.vmem [resolvable:$true] %s136_s8 }
  0x17   :  { %165 = vmatpush3.bf16.msra.mxu0 %v164_v6  ;;  %v146_v11 = vld [vmem:[%s297_s3] ss:$0 sm:$0xff]  ;;  %s202_s0 = scalar_lea.vmem %s137_s8, 128  ;;  %p207_p9 = scmp.lt.s32.totalorder %s137_s8, %s137_s8 }
  0x18   :  { %166 = vmatprep.subr.bf16.mxu0 %v231_v0  ;;  %p203_p8 = scmp.ne.s32.totalorder %s137_s8, %s202_s0  ;;  %p208_p10 = scmp.lt.s32.totalorder %s202_s0, %s202_s0 }
  0x1a   :  { %p209_p11 = por %p208_p10, %p207_p9 }
  0x1b   :  { %168 = vmatpush3.bf16.msra.mxu0 %v167_v9 }
  0x1c   :  { %p210_p12 = pnand %p209_p11, %p203_p8 }
  0x1e   :  { %161 = vmatmul.mubr.msk.f32.vlgmr.msra.gmra.mrb[0].mxu0 %vm37_vm1, %v32_v10 }
  0x95   :  { %v116_v12 = vpop.permute.xlu0 %115 }
  0x96   :  { %v124_v13 = vmul.f32 %v146_v11, %v116_v12 }
  0x98   :  { %v125_v14 = vmax.f32 %v124_v13, 1e-08 }
  0x9a   :  { %178 = vrcp.f32 %v125_v14 }
  0xa4   :  { %v179_v15 = vpop.eup %178 }
  0xf1   :  { %v107_v16 = vpop.f32.mrb[0].mxu0 }
  0xf2   :  { %v127_v17 = vmul.f32 %v179_v15, %v107_v16  ;;  %v162_v18 = vpop.f32.mrb[1].mxu0 }
  0xf4   :  { %v128_v19 = vmul.f32 20.0, %v127_v17 }
  0xf6   :  { %129 = vst [vmem:[#allocation5] sm:$0xff] %v128_v19 }
  0xf7   :  { %213 = shalt.err (!%p210_p12)
}
  0xf8   :  { %s214_s10 = scalar_lea.hbm %s298_s4, 128 }
  0xf9   :  { %p215_p13 = scmp.ne.s32.totalorder %s298_s4, %s214_s10  ;;  %p218_p0 = scmp.lt.u32.totalorder %s214_s10, %s298_s4 }
  0xfb   :  { %p220_p1 = pnand %p218_p0, %p215_p13 }
  0xfd   :  { %223 = shalt.err (!%p220_p1)
}
  0xfe   :  { %139 = dma.vmem_to_hbm [thread:$0]  %s137_s8, 128, %s298_s4, [#allocation4]  }
  0xff   :  { %226 = dma.done.wait [#allocation4], 128  }
 0x100   :  { %227 = vsyncadd [#allocation4], 4294967168 }
 0x101   :  { %143 = vsyncpa [#allocation3], 1 }
 0x102   :  { %144 = vsyncpa [#allocation4], 1 }

</bundles_post_ra>
